<compile_context>
chip_gen: v5e
topology: v5e:2x2
jax: 0.10.0
libtpu: 0.0.40
codegen_flags: <defaults>
</compile_context>

<pallas_src>
import functools

import jax
import jax.numpy as jnp
from jax.experimental import pallas as pl
from jax.experimental.pallas import tpu as pltpu

NEG_SLOPE_ACT = 0.01   # F.leaky_relu default slope (node_init + SkipGAT activations)
NEG_SLOPE_ATT = 0.2    # GATv2Conv internal leaky_relu slope


# --------------------------------------------------------------------- fused linear (MXU)

def _linear_kernel(x_ref, w_ref, b_ref, o_ref, *, activation):
    y = jnp.dot(x_ref[...], w_ref[...], preferred_element_type=jnp.float32) + b_ref[...]
    if activation:
        y = jnp.where(y > 0, y, NEG_SLOPE_ACT * y)
    o_ref[...] = y


def linear(x, w, b, activation=False, tile_m=256):
    """[M,K] @ [K,F] + b (+ optional fused leaky_relu).  bf16 MXU operands, f32 epilogue."""
    m, k = x.shape
    f = w.shape[1]
    tm = m if m <= tile_m else tile_m
    mp = pl.cdiv(m, tm) * tm
    x_b = x.astype(jnp.bfloat16)
    if mp != m:
        x_b = jnp.pad(x_b, ((0, mp - m), (0, 0)))
    out = pl.pallas_call(
        functools.partial(_linear_kernel, activation=activation),
        grid=(mp // tm,),
        in_specs=[
            pl.BlockSpec((tm, k), lambda i: (i, 0)),
            pl.BlockSpec((k, f), lambda i: (0, 0)),
            pl.BlockSpec((1, f), lambda i: (0, 0)),
        ],
        out_specs=pl.BlockSpec((tm, f), lambda i: (i, 0)),
        out_shape=jax.ShapeDtypeStruct((mp, f), jnp.float32),
        compiler_params=pltpu.CompilerParams(dimension_semantics=("parallel",)),
    )(x_b, w.astype(jnp.bfloat16), b.reshape(1, f).astype(jnp.float32))
    return out[:m] if mp != m else out


# ------------------------------------------------ fused GATv2 conv + skip + activation

def _skipgat_conv_kernel(xl_ref, xr_ref, adj_ref, att_ref, bias_ref, skip_ref,
                         o_ref, m_sc, l_sc, acc_sc, *, heads, d):
    ks = pl.program_id(1)

    @pl.when(ks == 0)
    def _():
        m_sc[...] = jnp.full(m_sc.shape, -jnp.inf, jnp.float32)
        l_sc[...] = jnp.zeros(l_sc.shape, jnp.float32)
        acc_sc[...] = jnp.zeros(acc_sc.shape, jnp.float32)

    xl = xl_ref[...]            # [tns, H*D]  lin_l(x_src), f32
    xr = xr_ref[...]            # [tnd, H*D]  lin_r(x_dst), f32
    att = att_ref[...]          # [1,   H*D]
    mask = adj_ref[...] > 0     # [tnd, tns]  adj[i, j] == 1 iff edge j -> i  (bf16 stream)

    for h in range(heads):      # heads is small & static -> unrolled
        sl = slice(h * d, (h + 1) * d)
        xl_h = xl[:, sl]                                   # [tns, D]
        xr_h = xr[:, sl]                                   # [tnd, D]
        att_h = jnp.reshape(att[:, sl], (1, 1, d))

        # GATv2: e_ij = att . leaky_relu(x_l[j] + x_r[i])
        z = xr_h[:, None, :] + xl_h[None, :, :]            # [tnd, tns, D]
        z = jnp.where(z > 0, z, NEG_SLOPE_ATT * z)
        s = jnp.sum(z * att_h, axis=-1)                    # [tnd, tns]
        s = jnp.where(mask, s, -1e30)

        # online (flash-style) masked softmax over source tiles
        m_old = m_sc[h]                                    # [tnd, 1]
        m_new = jnp.maximum(m_old, jnp.max(s, axis=-1, keepdims=True))
        scale = jnp.exp(m_old - m_new)
        p = jnp.where(mask, jnp.exp(s - m_new), 0.0)       # keep the mask multiply!
        l_sc[h] = scale * l_sc[h] + jnp.sum(p, axis=-1, keepdims=True)
        acc_sc[h] = scale * acc_sc[h] + jnp.dot(
            p.astype(jnp.bfloat16), xl_h.astype(jnp.bfloat16),
            preferred_element_type=jnp.float32)
        m_sc[h] = m_new

    @pl.when(ks == pl.num_programs(1) - 1)
    def _():
        # normalize, concat heads, add GATv2 bias, fuse skip add + leaky_relu,
        # single lane-dense [tnd, H*D] store.
        outs = []
        for h in range(heads):
            inv = pl.reciprocal(jnp.maximum(l_sc[h], 1e-20), approx=True)
            outs.append(acc_sc[h] * inv)                   # rows with no in-edges -> 0
        y = jnp.concatenate(outs, axis=-1) + bias_ref[...] + skip_ref[...]
        o_ref[...] = jnp.where(y > 0, y, NEG_SLOPE_ACT * y)


def skipgat_conv(xl, xr, adj, skip, att, bias, *, heads, d,
                 tile_nd=128, tile_ns=128):
    """leaky_relu( GATv2Conv((x_src,x_dst), adj) + skip ), output [Nd, H*D]."""
    ns, nd = xl.shape[0], xr.shape[0]
    hd = heads * d

    tnd = nd if nd <= tile_nd else tile_nd
    tns = ns if ns <= tile_ns else tile_ns
    nd_p = pl.cdiv(nd, tnd) * tnd
    ns_p = pl.cdiv(ns, tns) * tns
    if nd_p != nd:
        xr = jnp.pad(xr, ((0, nd_p - nd), (0, 0)))
        skip = jnp.pad(skip, ((0, nd_p - nd), (0, 0)))
    if ns_p != ns:
        xl = jnp.pad(xl, ((0, ns_p - ns), (0, 0)))
    if nd_p != nd or ns_p != ns:
        adj = jnp.pad(adj, ((0, nd_p - nd), (0, ns_p - ns)))

    out = pl.pallas_call(
        functools.partial(_skipgat_conv_kernel, heads=heads, d=d),
        grid=(nd_p // tnd, ns_p // tns),
        in_specs=[
            pl.BlockSpec((tns, hd), lambda i, ks: (ks, 0)),   # xl  (source nodes)
            pl.BlockSpec((tnd, hd), lambda i, ks: (i, 0)),    # xr  (dest nodes)
            pl.BlockSpec((tnd, tns), lambda i, ks: (i, ks)),  # adjacency mask (bf16)
            pl.BlockSpec((1, hd), lambda i, ks: (0, 0)),      # attention vector
            pl.BlockSpec((1, hd), lambda i, ks: (0, 0)),      # GATv2 bias
            pl.BlockSpec((tnd, hd), lambda i, ks: (i, 0)),    # skip branch (HeteroDictLinear)
        ],
        out_specs=pl.BlockSpec((tnd, hd), lambda i, ks: (i, 0)),
        out_shape=jax.ShapeDtypeStruct((nd_p, hd), jnp.float32),
        scratch_shapes=[
            pltpu.VMEM((heads, tnd, 1), jnp.float32),   # running max  m
            pltpu.VMEM((heads, tnd, 1), jnp.float32),   # running sum  l
            pltpu.VMEM((heads, tnd, d), jnp.float32),   # running weighted sum
        ],
        compiler_params=pltpu.CompilerParams(
            dimension_semantics=("parallel", "arbitrary")),
    )(xl.astype(jnp.float32), xr.astype(jnp.float32), adj.astype(jnp.bfloat16),
      att.reshape(1, hd).astype(jnp.float32), bias.reshape(1, hd).astype(jnp.float32),
      skip.astype(jnp.float32))

    return out[:nd] if nd_p != nd else out


# ----------------------------------------------------------------------------- params

def init_linear(key, fin, fout):
    k1, k2 = jax.random.split(key)
    return {"w": jax.random.normal(k1, (fin, fout), jnp.float32) * 0.1,
            "b": jax.random.normal(k2, (fout,), jnp.float32) * 0.01}


def init_gat(key, fin, out, heads):
    ks = jax.random.split(key, 4)
    return {"lin_l": init_linear(ks[0], fin, heads * out),
            "lin_r": init_linear(ks[1], fin, heads * out),
            "att": jax.random.normal(ks[2], (heads, out), jnp.float32) * 0.1,
            "bias": jax.random.normal(ks[3], (heads * out,), jnp.float32) * 0.01}


def init_skipgat(key, fin, out, heads):
    ks = jax.random.split(key, 4)
    return {"gat_tx": init_gat(ks[0], fin, out, heads),    # ('tx','neighbors','tx')
            "gat_bd": init_gat(ks[1], fin, out, heads),    # ('tx','belongs','bd')
            "lin_tx": init_linear(ks[2], fin, heads * out),
            "lin_bd": init_linear(ks[3], fin, heads * out)}


def init_segger(key, num_node_features, init_emb, hidden, num_mid, out_ch, heads):
    ks = jax.random.split(key, 6 + num_mid)
    return {
        "emb_tx": jax.random.normal(ks[0], (num_node_features["tx"], init_emb), jnp.float32) * 0.1,
        "init_bd": init_linear(ks[1], num_node_features["bd"], init_emb),
        "conv1": init_skipgat(ks[2], init_emb, hidden, heads),
        "mid": [init_skipgat(ks[3 + i], heads * hidden, hidden, heads) for i in range(num_mid)],
        "conv_last": init_skipgat(ks[3 + num_mid], heads * hidden, out_ch, heads),
        "final_tx": init_linear(ks[4 + num_mid], heads * out_ch, out_ch),
        "final_bd": init_linear(ks[5 + num_mid], heads * out_ch, out_ch),
    }


# ----------------------------------------------------------------------------- forward

def skipgat_forward(p, x_tx, x_bd, adj_tt, adj_tb, heads, d):
    """One SkipGAT layer: HeteroConv(GATv2) + HeteroDictLinear skip + leaky_relu."""
    hd = heads * d

    # Merged projections: all matmuls sharing x_tx (gat_tx.lin_l / gat_tx.lin_r /
    # gat_bd.lin_l / skip lin_tx) as ONE wide MXU pass; same for x_bd.
    w_tx = jnp.concatenate([p["gat_tx"]["lin_l"]["w"], p["gat_tx"]["lin_r"]["w"],
                            p["gat_bd"]["lin_l"]["w"], p["lin_tx"]["w"]], axis=1)
    b_tx = jnp.concatenate([p["gat_tx"]["lin_l"]["b"], p["gat_tx"]["lin_r"]["b"],
                            p["gat_bd"]["lin_l"]["b"], p["lin_tx"]["b"]], axis=0)
    y_tx = linear(x_tx, w_tx, b_tx)                       # [n_tx, 4*H*D]

    w_bd = jnp.concatenate([p["gat_bd"]["lin_r"]["w"], p["lin_bd"]["w"]], axis=1)
    b_bd = jnp.concatenate([p["gat_bd"]["lin_r"]["b"], p["lin_bd"]["b"]], axis=0)
    y_bd = linear(x_bd, w_bd, b_bd)                       # [n_bd, 2*H*D]

    xl_tt, xr_tt = y_tx[:, 0:hd], y_tx[:, hd:2 * hd]
    xl_tb, skip_tx = y_tx[:, 2 * hd:3 * hd], y_tx[:, 3 * hd:4 * hd]
    xr_tb, skip_bd = y_bd[:, 0:hd], y_bd[:, hd:2 * hd]

    h_tx = skipgat_conv(xl_tt, xr_tt, adj_tt, skip_tx,
                        p["gat_tx"]["att"], p["gat_tx"]["bias"], heads=heads, d=d)
    h_bd = skipgat_conv(xl_tb, xr_tb, adj_tb, skip_bd,
                        p["gat_bd"]["att"], p["gat_bd"]["bias"], heads=heads, d=d)
    return h_tx, h_bd


def segger_forward(params, x_dict, edge_index_dict, n_tx, n_bd, hidden, out_ch, heads):
    # node_init: token embedding for 'tx' as a gather (not a one-hot matmul),
    # Linear (+ fused leaky_relu) for 'bd'.  The tx gather + leaky_relu is tiny glue
    # kept in plain JAX rather than a dedicated Pallas kernel.
    emb = jnp.take(params["emb_tx"], x_dict["tx"], axis=0)
    h_tx = jnp.where(emb > 0, emb, NEG_SLOPE_ACT * emb)
    h_bd = linear(x_dict["bd"], params["init_bd"]["w"], params["init_bd"]["b"],
                  activation=True)

    # dense adjacency masks streamed as bf16 (duplicate-free edge lists assumed)
    e_tt = edge_index_dict[("tx", "neighbors", "tx")]
    e_tb = edge_index_dict[("tx", "belongs", "bd")]
    adj_tt = jnp.zeros((n_tx, n_tx), jnp.bfloat16).at[e_tt[1], e_tt[0]].set(1.0)
    adj_tt = jnp.maximum(adj_tt, jnp.eye(n_tx, dtype=jnp.bfloat16))   # add_self_loops=True
    adj_tb = jnp.zeros((n_bd, n_tx), jnp.bfloat16).at[e_tb[1], e_tb[0]].set(1.0)  # no self loops

    h_tx, h_bd = skipgat_forward(params["conv1"], h_tx, h_bd, adj_tt, adj_tb, heads, hidden)
    for p in params["mid"]:
        h_tx, h_bd = skipgat_forward(p, h_tx, h_bd, adj_tt, adj_tb, heads, hidden)
    h_tx, h_bd = skipgat_forward(params["conv_last"], h_tx, h_bd, adj_tt, adj_tb, heads, out_ch)

    out_tx = linear(h_tx, params["final_tx"]["w"], params["final_tx"]["b"])
    out_bd = linear(h_bd, params["final_bd"]["w"], params["final_bd"]["b"])
    return {"tx": out_tx, "bd": out_bd}


# ----------------------------------------------------------------------------- demo

if __name__ == "__main__":
    key = jax.random.PRNGKey(0)
    num_node_features = {"tx": 20, "bd": 6}     # tx vocab size (token-based), bd feature dim
    init_emb, hidden, num_mid, out_ch, heads = 16, 16, 1, 16, 2
    n_tx, n_bd = 16, 8

    kp, kx, kb = jax.random.split(key, 3)
    params = init_segger(kp, num_node_features, init_emb, hidden, num_mid, out_ch, heads)

    tx_tokens = jax.random.randint(kx, (n_tx,), 0, num_node_features["tx"])
    bd_feats = jax.random.normal(kb, (n_bd, num_node_features["bd"]), jnp.float32)

    # deterministic, duplicate-free edge lists: edge_index[0]=src, edge_index[1]=dst
    edges_tt = [(s, d) for s in range(n_tx) for d in range(n_tx) if (3 * s + 5 * d) % 7 == 0]
    edges_tb = [(s, d) for s in range(n_tx) for d in range(n_bd) if (s + 2 * d) % 5 == 0]
    e_tt = jnp.array(edges_tt, dtype=jnp.int32).T
    e_tb = jnp.array(edges_tb, dtype=jnp.int32).T

    x_dict = {"tx": tx_tokens, "bd": bd_feats}
    edge_index_dict = {("tx", "neighbors", "tx"): e_tt, ("tx", "belongs", "bd"): e_tb}

    # TODO(synk): head_dim is left unpadded (<128 lanes); lane-padding D would further
    # improve VPU/MXU utilization at realistic sizes but is omitted here for clarity.
    out = segger_forward(params, x_dict, edge_index_dict, n_tx, n_bd, hidden, out_ch, heads)
    jax.block_until_ready(out)
    assert out["tx"].shape == (n_tx, out_ch)
    assert out["bd"].shape == (n_bd, out_ch)
    print("KERNEL_OK")
</pallas_src>

<mosaic_0001>
module attributes {stable_mosaic.version = 11 : i64} {
  func.func @_linear_kernel(%arg0: i32, %arg1: memref<8x6xbf16, #tpu.memory_space<vmem>>, %arg2: memref<6x16xbf16, #tpu.memory_space<vmem>>, %arg3: memref<1x16xf32, #tpu.memory_space<vmem>>, %arg4: memref<8x16xf32, #tpu.memory_space<vmem>>) attributes {dimension_semantics = [#tpu.dimension_semantics<parallel>], iteration_bounds = array<i64: 1>, scalar_prefetch = 0 : i64, scratch_operands = 0 : i64, tpu.core_type = #tpu.core_type<tc>, window_params = [{transform_indices = @transform_0, window_bounds = array<i64: 8, 6>}, {pipeline_mode = #tpu.pipeline_mode<synchronous>, transform_indices = @transform_1, window_bounds = array<i64: 6, 16>}, {pipeline_mode = #tpu.pipeline_mode<synchronous>, transform_indices = @transform_2, window_bounds = array<i64: 1, 16>}, {transform_indices = @transform_3, window_bounds = array<i64: 8, 16>}]} {
    %c0 = arith.constant 0 : index
    %c0_0 = arith.constant 0 : index
    %0 = vector.load %arg1[%c0, %c0_0] : memref<8x6xbf16, #tpu.memory_space<vmem>>, vector<8x6xbf16>
    %c0_1 = arith.constant 0 : index
    %c0_2 = arith.constant 0 : index
    %1 = vector.load %arg2[%c0_1, %c0_2] : memref<6x16xbf16, #tpu.memory_space<vmem>>, vector<6x16xbf16>
    %cst = arith.constant dense<0.000000e+00> : vector<8x16xf32>
    %2 = tpu.matmul %0, %1, %cst {dimension_numbers = #tpu.dot_dimension_numbers<[1], [0], [0], [1], [0, 0, 1, 1], [], []>} : vector<8x6xbf16>, vector<6x16xbf16>, vector<8x16xf32> -> vector<8x16xf32>
    %c0_3 = arith.constant 0 : index
    %c0_4 = arith.constant 0 : index
    %3 = vector.load %arg3[%c0_3, %c0_4] : memref<1x16xf32, #tpu.memory_space<vmem>>, vector<1x16xf32>
    %4 = vector.broadcast %3 : vector<1x16xf32> to vector<8x16xf32>
    %5 = arith.addf %2, %4 : vector<8x16xf32>
    %cst_5 = arith.constant 0.000000e+00 : f32
    %6 = vector.broadcast %cst_5 : f32 to vector<8x16xf32>
    %7 = arith.cmpf ogt, %5, %6 : vector<8x16xf32>
    %cst_6 = arith.constant 0.00999999977 : f32
    %8 = vector.broadcast %cst_6 : f32 to vector<8x16xf32>
    %9 = arith.mulf %8, %5 : vector<8x16xf32>
    %10 = arith.select %7, %5, %9 : vector<8x16xi1>, vector<8x16xf32>
    %c0_7 = arith.constant 0 : index
    %c0_8 = arith.constant 0 : index
    %11 = vector.load %arg4[%c0_7, %c0_8] : memref<8x16xf32, #tpu.memory_space<vmem>>, vector<8x16xf32>
    tpu.vector_store %arg4[%c0_7, %c0_8], %10 {strides = array<i32>} : memref<8x16xf32, #tpu.memory_space<vmem>>, vector<8x16xf32>,
    return
  }
  func.func @transform_0(%arg0: i32) -> (i32, i32) {
    %c0_i32 = arith.constant 0 : i32
    %c0_i32_0 = arith.constant 0 : i32
    return %arg0, %c0_i32 : i32, i32
  }
  func.func @transform_1(%arg0: i32) -> (i32, i32) {
    %c0_i32 = arith.constant 0 : i32
    %c0_i32_0 = arith.constant 0 : i32
    %c0_i32_1 = arith.constant 0 : i32
    return %c0_i32, %c0_i32_0 : i32, i32
  }
  func.func @transform_2(%arg0: i32) -> (i32, i32) {
    %c0_i32 = arith.constant 0 : i32
    %c0_i32_0 = arith.constant 0 : i32
    %c0_i32_1 = arith.constant 0 : i32
    return %c0_i32, %c0_i32_0 : i32, i32
  }
  func.func @transform_3(%arg0: i32) -> (i32, i32) {
    %c0_i32 = arith.constant 0 : i32
    %c0_i32_0 = arith.constant 0 : i32
    return %arg0, %c0_i32 : i32, i32
  }
}

</mosaic_0001>

<bundles_post_ra>
// kernel: tpu_custom_call.1
= control target key start
LH: loop header
LB: loop body
LE: loop exit
PB: predicated region body
PF: predicated region fallthrough
CT: control target
= control target key end

     0   :  { %8 = vsyncpa [#allocation3], 0  ;;  %s212_s0 = inlined_call_operand.hbm [shape: bf16[8,6], index: 0, kind: input, shape index: {}]   ;;  %s213_s1 = inlined_call_operand.hbm [shape: bf16[6,16], index: 1, kind: input, shape index: {}]   ;;  %s214_s2 = inlined_call_operand.vmem [shape: f32[1,16], index: 2, kind: input, shape index: {}]   ;;  %s215_s3 = inlined_call_operand.hbm [shape: f32[8,16], index: 3, kind: output, shape index: {}]  }
   0x1   :  { %9 = vsyncpa [#allocation6], 0 }
   0x2   :  { %10 = vsyncpa [#allocation4], 0  ;;  %s16_s14 = sshll.u32 %s212_s0, 4  ;;  %s177_s15 = smov [#allocation2]   ;;  %s17_s14 = int_to_ptr.hbm [resolvable:$true] %s16_s14 }
   0x3   :  { %s18_s16 = sshll.u32 %s177_s15, 4  ;;  %s27_s19 = sshll.u32 %s213_s1, 4  ;;  %s19_s16 = int_to_ptr.vmem [resolvable:$true] %s18_s16  ;;  %s28_s19 = int_to_ptr.hbm [resolvable:$true] %s27_s19 }
   0x4   :  { %21 = dma.hbm_to_vmem [thread:$0]  %s17_s14, 64, %s19_s16, [#allocation3]  }
   0x5   :  { %s178_s20 = smov [#allocation5]  }
   0x6   :  { %s29_s21 = sshll.u32 %s178_s20, 4  ;;  %s30_s21 = int_to_ptr.vmem [resolvable:$true] %s29_s21 }
   0x7   :  { %32 = dma.hbm_to_vmem [thread:$0]  %s28_s19, 64, %s30_s21, [#allocation6]  }
   0x8   :  { %171 = dma.done.wait [#allocation3], 64  }
   0x9   :  { %172 = vsyncadd [#allocation3], 4294967232 }
   0xa   :  { %173 = dma.done.wait [#allocation6], 64  }
   0xb   :  { %174 = vsyncadd [#allocation6], 4294967232  ;;  %vm54_vm0 = vcmask 1042432   ;;  %v45_v0 = vld [vmem:[#allocation5] sm:$0x7]  ;;  %vm50_vm1 = vcmask 48128  }
   0xc   :  { %v56_v1 = vsel %vm54_vm0, %v45_v0, 0  ;;  %v44_v2 = vld [vmem:[#allocation2] sm:$0xf]  ;;  %s179_s1 = smov [#allocation7]   ;;  %s83_s26 = sshll.u32 %s215_s3, 4  ;;  %vm74_vm3 = vcmask 130048   ;;  %s84_s26 = int_to_ptr.hbm [resolvable:$true] %s83_s26 }
   0xd   :  { %65 = vmatpush.bf16.msra.mxu0 %v56_v1  ;;  %v98_v3 = vld [vmem:[%s214_s2] ss:$0 sm:$0xff]  ;;  %s81_s23 = sshll.u32 %s179_s1, 4  ;;  %s82_s23 = int_to_ptr.vmem [resolvable:$true] %s81_s23 }
  0x10   :  { %94 = vmatmul.msk.bf16.vlgmr.msra.gmra.mxu0 %vm50_vm1, %v44_v2 }
  0x8d   :  { %v67_v4 = vpop.f32.mrf.mxu0 }
  0x8e   :  { %v68_v5 = vadd.f32 %v98_v3, %v67_v4 }
  0x90   :  { %vm71_vm2 = vcmp.gt.f32.partialorder %v68_v5, 0.0  ;;  %v72_v6 = vmul.f32 0.01, %v68_v5 }
  0x92   :  { %v73_v7 = vsel %vm71_vm2, %v68_v5, %v72_v6 }
  0x93   :  { %75 = vst.msk [vmem:[#allocation7] sm:$0xff] %vm74_vm3, %v73_v7 }
  0x94   :  { %86 = dma.vmem_to_hbm [thread:$0]  %s82_s23, 128, %s84_s26, [#allocation4]  }
  0x95   :  { %v69_v8 = vpop.f32.mrf.mxu0 }
  0x96   :  { %175 = dma.done.wait [#allocation4], 128  }
  0x97   :  { %176 = vsyncadd [#allocation4], 4294967168 }
  0x98   :  { %91 = vsyncpa [#allocation3], 1 }
  0x99   :  { %92 = vsyncpa [#allocation6], 1 }
  0x9a   :  { %93 = vsyncpa [#allocation4], 1 }

</bundles_post_ra>
